<compile_context>
chip_gen: v5e
topology: v5e:2x2
jax: 0.10.0
libtpu: 0.0.40
codegen_flags: <defaults>
</compile_context>

<pallas_src>
import jax
import jax.numpy as jnp
from jax.experimental import pallas as pl
from jax.experimental.pallas import tpu as pltpu

LANE = 128
SUBLANE = 8


def _round_up(n, m):
    return ((n + m - 1) // m) * m


def qnet_kernel(x_ref, w1_ref, b1_ref, w2_ref, b2_ref, w3_ref, b3_ref, o_ref):
    # fc1 + ReLU: matmul in the weight dtype (f32 or bf16), f32 accumulate,
    # f32 bias + ReLU epilogue on the VPU.
    h1 = jnp.dot(x_ref[...], w1_ref[...], preferred_element_type=jnp.float32)
    h1 = jnp.maximum(h1 + b1_ref[...], 0.0)
    # fc2 + ReLU
    h2 = jnp.dot(h1.astype(w2_ref.dtype), w2_ref[...],
                 preferred_element_type=jnp.float32)
    h2 = jnp.maximum(h2 + b2_ref[...], 0.0)
    # fc3 (no activation)
    out = jnp.dot(h2.astype(w3_ref.dtype), w3_ref[...],
                  preferred_element_type=jnp.float32)
    o_ref[...] = (out + b3_ref[...]).astype(o_ref.dtype)


def qnet_forward(x, w1, b1, w2, b2, w3, b3, *, tile_b=128,
                 compute_dtype=jnp.float32):
    B, I = x.shape
    H1 = w1.shape[1]
    H2 = w2.shape[1]
    O = w3.shape[1]

    # ---- layout plumbing (all padding in the wrapper, sliced off after) ----
    # Batch tile: multiple of 8 (f32 sublanes); shrink for tiny batches.
    tb = min(_round_up(tile_b, SUBLANE), _round_up(max(B, 1), SUBLANE))
    B_pad = _round_up(max(B, 1), tb)
    # Every matmul N-dim padded to a lane-dense multiple of 128.
    H1_pad = _round_up(H1, LANE)
    H2_pad = _round_up(H2, LANE)
    O_pad = _round_up(O, LANE)

    cd = jnp.dtype(compute_dtype)
    x_p = jnp.zeros((B_pad, I), cd).at[:B, :].set(x.astype(cd))
    w1_p = jnp.zeros((I, H1_pad), cd).at[:, :H1].set(w1.astype(cd))
    w2_p = jnp.zeros((H1_pad, H2_pad), cd).at[:H1, :H2].set(w2.astype(cd))
    w3_p = jnp.zeros((H2_pad, O_pad), cd).at[:H2, :O].set(w3.astype(cd))
    b1_p = jnp.zeros((1, H1_pad), jnp.float32).at[:, :H1].set(b1.astype(jnp.float32))
    b2_p = jnp.zeros((1, H2_pad), jnp.float32).at[:, :H2].set(b2.astype(jnp.float32))
    b3_p = jnp.zeros((1, O_pad), jnp.float32).at[:, :O].set(b3.astype(jnp.float32))

    grid = (B_pad // tb,)

    grid_spec = pl.GridSpec(
        grid=grid,
        in_specs=[
            pl.BlockSpec((tb, I), lambda i: (i, 0)),        # x: tiled along batch
            pl.BlockSpec((I, H1_pad), lambda i: (0, 0)),    # weights/biases: constant
            pl.BlockSpec((1, H1_pad), lambda i: (0, 0)),    #   block index -> VMEM-resident
            pl.BlockSpec((H1_pad, H2_pad), lambda i: (0, 0)),
            pl.BlockSpec((1, H2_pad), lambda i: (0, 0)),
            pl.BlockSpec((H2_pad, O_pad), lambda i: (0, 0)),
            pl.BlockSpec((1, O_pad), lambda i: (0, 0)),
        ],
        out_specs=pl.BlockSpec((tb, O_pad), lambda i: (i, 0)),
    )

    flops = 2 * B_pad * (I * H1_pad + H1_pad * H2_pad + H2_pad * O_pad)
    bytes_accessed = (
        x_p.size * x_p.dtype.itemsize
        + w1_p.size * w1_p.dtype.itemsize
        + w2_p.size * w2_p.dtype.itemsize
        + w3_p.size * w3_p.dtype.itemsize
        + (b1_p.size + b2_p.size + b3_p.size) * 4
        + B_pad * O_pad * 4
    )

    out = pl.pallas_call(
        qnet_kernel,
        out_shape=jax.ShapeDtypeStruct((B_pad, O_pad), jnp.float32),
        grid_spec=grid_spec,
        compiler_params=pltpu.CompilerParams(
            # Batch blocks are independent -> shard across TensorCores (v7x megacore).
            dimension_semantics=("parallel",),
        ),
        cost_estimate=pl.CostEstimate(
            flops=flops, transcendentals=0, bytes_accessed=bytes_accessed
        ),
    )(x_p, w1_p, b1_p, w2_p, b2_p, w3_p, b3_p)

    return out[:B, :O]


def ref_forward(x, w1, b1, w2, b2, w3, b3, compute_dtype=jnp.float32):
    """Pure-JAX reference with the same dtype policy as the kernel."""
    cd = jnp.dtype(compute_dtype)
    h1 = jnp.maximum(
        jnp.dot(x.astype(cd), w1.astype(cd), preferred_element_type=jnp.float32) + b1, 0.0)
    h2 = jnp.maximum(
        jnp.dot(h1.astype(cd), w2.astype(cd), preferred_element_type=jnp.float32) + b2, 0.0)
    return jnp.dot(h2.astype(cd), w3.astype(cd), preferred_element_type=jnp.float32) + b3


def init_linear(key, fan_in, fan_out):
    """Mirrors PyTorch nn.Linear default init: U(-1/sqrt(fan_in), 1/sqrt(fan_in))."""
    kw, kb = jax.random.split(key)
    bound = 1.0 / jnp.sqrt(fan_in)
    w = jax.random.uniform(kw, (fan_in, fan_out), jnp.float32, -bound, bound)
    b = jax.random.uniform(kb, (1, fan_out), jnp.float32, -bound, bound)
    return w, b


if __name__ == "__main__":
    # QNet(input_size=4, hidden_size=32, output_size=2); batch of 2 states.
    input_size, hidden_size, output_size = 4, 32, 2
    batch = 2

    key = jax.random.PRNGKey(0)
    kx, k1, k2, k3 = jax.random.split(key, 4)

    x = jax.random.normal(kx, (batch, input_size), jnp.float32)
    w1, b1 = init_linear(k1, input_size, hidden_size)
    w2, b2 = init_linear(k2, hidden_size, hidden_size)
    w3, b3 = init_linear(k3, hidden_size, output_size)

    # f32 path: matches the PyTorch module's numerics.
    out_f32 = jax.block_until_ready(
        qnet_forward(x, w1, b1, w2, b2, w3, b3, compute_dtype=jnp.float32))
    ref_f32 = ref_forward(x, w1, b1, w2, b2, w3, b3, jnp.float32)
    assert out_f32.shape == (batch, output_size)
    assert jnp.allclose(out_f32, ref_f32, atol=1e-5, rtol=1e-5), "f32 mismatch vs reference"

    # bf16 matmul-input path (v6e/v7x MXU-native), f32 accumulate + f32 epilogue.
    out_bf16 = jax.block_until_ready(
        qnet_forward(x, w1, b1, w2, b2, w3, b3, compute_dtype=jnp.bfloat16))
    ref_bf16 = ref_forward(x, w1, b1, w2, b2, w3, b3, jnp.bfloat16)
    assert jnp.allclose(out_bf16, ref_bf16, atol=5e-2, rtol=5e-2), "bf16 mismatch vs reference"

    # Larger batch exercising the tiled / pipelined / multi-step-grid path.
    x_big = jax.random.normal(kx, (512, input_size), jnp.float32)
    out_big = jax.block_until_ready(
        qnet_forward(x_big, w1, b1, w2, b2, w3, b3, tile_b=128,
                     compute_dtype=jnp.float32))
    ref_big = ref_forward(x_big, w1, b1, w2, b2, w3, b3, jnp.float32)
    assert out_big.shape == (512, output_size)
    assert jnp.allclose(out_big, ref_big, atol=1e-5, rtol=1e-5), "tiled mismatch vs reference"

    print("KERNEL_OK")
</pallas_src>

<mosaic_0001>
module attributes {stable_mosaic.version = 11 : i64} {
  func.func @qnet_kernel(%arg0: i32, %arg1: memref<8x4xf32, #tpu.memory_space<vmem>>, %arg2: memref<4x128xf32, #tpu.memory_space<vmem>>, %arg3: memref<1x128xf32, #tpu.memory_space<vmem>>, %arg4: memref<128x128xf32, #tpu.memory_space<vmem>>, %arg5: memref<1x128xf32, #tpu.memory_space<vmem>>, %arg6: memref<128x128xf32, #tpu.memory_space<vmem>>, %arg7: memref<1x128xf32, #tpu.memory_space<vmem>>, %arg8: memref<8x128xf32, #tpu.memory_space<vmem>>) attributes {dimension_semantics = [#tpu.dimension_semantics<parallel>], iteration_bounds = array<i64: 1>, scalar_prefetch = 0 : i64, scratch_operands = 0 : i64, tpu.core_type = #tpu.core_type<tc>, window_params = [{transform_indices = @transform_0, window_bounds = array<i64: 8, 4>}, {pipeline_mode = #tpu.pipeline_mode<synchronous>, transform_indices = @transform_1, window_bounds = array<i64: 4, 128>}, {pipeline_mode = #tpu.pipeline_mode<synchronous>, transform_indices = @transform_2, window_bounds = array<i64: 1, 128>}, {pipeline_mode = #tpu.pipeline_mode<synchronous>, transform_indices = @transform_3, window_bounds = array<i64: 128, 128>}, {pipeline_mode = #tpu.pipeline_mode<synchronous>, transform_indices = @transform_4, window_bounds = array<i64: 1, 128>}, {pipeline_mode = #tpu.pipeline_mode<synchronous>, transform_indices = @transform_5, window_bounds = array<i64: 128, 128>}, {pipeline_mode = #tpu.pipeline_mode<synchronous>, transform_indices = @transform_6, window_bounds = array<i64: 1, 128>}, {transform_indices = @transform_7, window_bounds = array<i64: 8, 128>}]} {
    %c0 = arith.constant 0 : index
    %c0_0 = arith.constant 0 : index
    %0 = vector.load %arg1[%c0, %c0_0] : memref<8x4xf32, #tpu.memory_space<vmem>>, vector<8x4xf32>
    %c0_1 = arith.constant 0 : index
    %c0_2 = arith.constant 0 : index
    %1 = vector.load %arg2[%c0_1, %c0_2] : memref<4x128xf32, #tpu.memory_space<vmem>>, vector<4x128xf32>
    %cst = arith.constant dense<0.000000e+00> : vector<8x128xf32>
    %2 = tpu.matmul %0, %1, %cst {dimension_numbers = #tpu.dot_dimension_numbers<[1], [0], [0], [1], [0, 0, 1, 1], [], []>} : vector<8x4xf32>, vector<4x128xf32>, vector<8x128xf32> -> vector<8x128xf32>
    %c0_3 = arith.constant 0 : index
    %c0_4 = arith.constant 0 : index
    %3 = vector.load %arg3[%c0_3, %c0_4] : memref<1x128xf32, #tpu.memory_space<vmem>>, vector<1x128xf32>
    %4 = vector.broadcast %3 : vector<1x128xf32> to vector<8x128xf32>
    %5 = arith.addf %2, %4 : vector<8x128xf32>
    %cst_5 = arith.constant 0.000000e+00 : f32
    %6 = vector.broadcast %cst_5 : f32 to vector<8x128xf32>
    %7 = arith.maximumf %5, %6 : vector<8x128xf32>
    %c0_6 = arith.constant 0 : index
    %c0_7 = arith.constant 0 : index
    %8 = vector.load %arg4[%c0_6, %c0_7] : memref<128x128xf32, #tpu.memory_space<vmem>>, vector<128x128xf32>
    %cst_8 = arith.constant dense<0.000000e+00> : vector<8x128xf32>
    %9 = tpu.matmul %7, %8, %cst_8 {dimension_numbers = #tpu.dot_dimension_numbers<[1], [0], [0], [1], [0, 0, 1, 1], [], []>} : vector<8x128xf32>, vector<128x128xf32>, vector<8x128xf32> -> vector<8x128xf32>
    %c0_9 = arith.constant 0 : index
    %c0_10 = arith.constant 0 : index
    %10 = vector.load %arg5[%c0_9, %c0_10] : memref<1x128xf32, #tpu.memory_space<vmem>>, vector<1x128xf32>
    %11 = vector.broadcast %10 : vector<1x128xf32> to vector<8x128xf32>
    %12 = arith.addf %9, %11 : vector<8x128xf32>
    %cst_11 = arith.constant 0.000000e+00 : f32
    %13 = vector.broadcast %cst_11 : f32 to vector<8x128xf32>
    %14 = arith.maximumf %12, %13 : vector<8x128xf32>
    %c0_12 = arith.constant 0 : index
    %c0_13 = arith.constant 0 : index
    %15 = vector.load %arg6[%c0_12, %c0_13] : memref<128x128xf32, #tpu.memory_space<vmem>>, vector<128x128xf32>
    %cst_14 = arith.constant dense<0.000000e+00> : vector<8x128xf32>
    %16 = tpu.matmul %14, %15, %cst_14 {dimension_numbers = #tpu.dot_dimension_numbers<[1], [0], [0], [1], [0, 0, 1, 1], [], []>} : vector<8x128xf32>, vector<128x128xf32>, vector<8x128xf32> -> vector<8x128xf32>
    %c0_15 = arith.constant 0 : index
    %c0_16 = arith.constant 0 : index
    %17 = vector.load %arg7[%c0_15, %c0_16] : memref<1x128xf32, #tpu.memory_space<vmem>>, vector<1x128xf32>
    %18 = vector.broadcast %17 : vector<1x128xf32> to vector<8x128xf32>
    %19 = arith.addf %16, %18 : vector<8x128xf32>
    %c0_17 = arith.constant 0 : index
    %c0_18 = arith.constant 0 : index
    %20 = vector.load %arg8[%c0_17, %c0_18] : memref<8x128xf32, #tpu.memory_space<vmem>>, vector<8x128xf32>
    tpu.vector_store %arg8[%c0_17, %c0_18], %19 {strides = array<i32>} : memref<8x128xf32, #tpu.memory_space<vmem>>, vector<8x128xf32>,
    return
  }
  func.func @transform_0(%arg0: i32) -> (i32, i32) {
    %c0_i32 = arith.constant 0 : i32
    %c0_i32_0 = arith.constant 0 : i32
    return %arg0, %c0_i32 : i32, i32
  }
  func.func @transform_1(%arg0: i32) -> (i32, i32) {
    %c0_i32 = arith.constant 0 : i32
    %c0_i32_0 = arith.constant 0 : i32
    %c0_i32_1 = arith.constant 0 : i32
    return %c0_i32, %c0_i32_0 : i32, i32
  }
  func.func @transform_2(%arg0: i32) -> (i32, i32) {
    %c0_i32 = arith.constant 0 : i32
    %c0_i32_0 = arith.constant 0 : i32
    %c0_i32_1 = arith.constant 0 : i32
    return %c0_i32, %c0_i32_0 : i32, i32
  }
  func.func @transform_3(%arg0: i32) -> (i32, i32) {
    %c0_i32 = arith.constant 0 : i32
    %c0_i32_0 = arith.constant 0 : i32
    %c0_i32_1 = arith.constant 0 : i32
    return %c0_i32, %c0_i32_0 : i32, i32
  }
  func.func @transform_4(%arg0: i32) -> (i32, i32) {
    %c0_i32 = arith.constant 0 : i32
    %c0_i32_0 = arith.constant 0 : i32
    %c0_i32_1 = arith.constant 0 : i32
    return %c0_i32, %c0_i32_0 : i32, i32
  }
  func.func @transform_5(%arg0: i32) -> (i32, i32) {
    %c0_i32 = arith.constant 0 : i32
    %c0_i32_0 = arith.constant 0 : i32
    %c0_i32_1 = arith.constant 0 : i32
    return %c0_i32, %c0_i32_0 : i32, i32
  }
  func.func @transform_6(%arg0: i32) -> (i32, i32) {
    %c0_i32 = arith.constant 0 : i32
    %c0_i32_0 = arith.constant 0 : i32
    %c0_i32_1 = arith.constant 0 : i32
    return %c0_i32, %c0_i32_0 : i32, i32
  }
  func.func @transform_7(%arg0: i32) -> (i32, i32) {
    %c0_i32 = arith.constant 0 : i32
    %c0_i32_0 = arith.constant 0 : i32
    return %arg0, %c0_i32 : i32, i32
  }
}

</mosaic_0001>

<bundles_post_ra>
// kernel: tpu_custom_call.1
= control target key start
LH: loop header
LB: loop body
LE: loop exit
PB: predicated region body
PF: predicated region fallthrough
CT: control target
= control target key end

     0   :  { %12 = vsyncpa [#allocation3], 0  ;;  %s351_s0 = inlined_call_operand.vmem [shape: f32[8,4], index: 0, kind: input, shape index: {}]   ;;  %s352_s1 = inlined_call_operand.vmem [shape: f32[4,128], index: 1, kind: input, shape index: {}]   ;;  %s353_s2 = inlined_call_operand.vmem [shape: f32[1,128], index: 2, kind: input, shape index: {}]   ;;  %s354_s3 = inlined_call_operand.hbm [shape: f32[128,128], index: 3, kind: input, shape index: {}]   ;;  %s355_s4 = inlined_call_operand.vmem [shape: f32[1,128], index: 4, kind: input, shape index: {}]   ;;  %s356_s5 = inlined_call_operand.hbm [shape: f32[128,128], index: 5, kind: input, shape index: {}]   ;;  %s357_s6 = inlined_call_operand.vmem [shape: f32[1,128], index: 6, kind: input, shape index: {}]   ;;  %s358_s7 = inlined_call_operand.hbm [shape: f32[8,128], index: 7, kind: output, shape index: {}]  }
   0x1   :  { %13 = vsyncpa [#allocation6], 0 }
   0x2   :  { %14 = vsyncpa [#allocation4], 0  ;;  %s25_s26 = sshll.u32 %s354_s3, 4  ;;  %s282_s27 = smov [#allocation2]   ;;  %s26_s26 = int_to_ptr.hbm [resolvable:$true] %s25_s26 }
   0x3   :  { %s27_s28 = sshll.u32 %s282_s27, 4  ;;  %s40_s8 = sshll.u32 %s356_s5, 4  ;;  %s28_s28 = int_to_ptr.vmem [resolvable:$true] %s27_s28  ;;  %s41_s8 = int_to_ptr.hbm [resolvable:$true] %s40_s8 }
   0x4   :  { %s283_s9 = smov 128   ;;  %s284_s10 = smov 8  }
   0x5   :  { %33 = dma.hbm_to_vmem [thread:$0]  %s26_s26, 2048, %s28_s28, [#allocation3], %s283_s9, %s283_s9, %s284_s10  }
   0x6   :  { %s285_s11 = smov [#allocation5]  }
   0x7   :  { %s42_s12 = sshll.u32 %s285_s11, 4  ;;  %s43_s12 = int_to_ptr.vmem [resolvable:$true] %s42_s12 }
   0x8   :  { %48 = dma.hbm_to_vmem [thread:$0]  %s41_s8, 2048, %s43_s12, [#allocation6], %s283_s9, %s283_s9, %s284_s10  }
   0x9   :  { %276 = dma.done.wait [#allocation3], 2048  }
   0xa   :  { %277 = vsyncadd [#allocation3], 4294965248 }
   0xb   :  { %278 = dma.done.wait [#allocation6], 2048  }
   0xc   :  { %279 = vsyncadd [#allocation6], 4294965248  ;;  %vm69_vm0 = vcmask 1043456   ;;  %vm65_vm1 = vcmask 31744   ;;  %v60_v0 = vld [vmem:[%s352_s1] sm:$0xf] }
   0xd   :  { %v59_v1 = vld [vmem:[%s351_s0] sm:$0xff]  ;;  %v109_v2 = vld [vmem:[#allocation2 + $0x78] sm:$0xff]  ;;  %194 = vmatpush.msk.msra.mxu0 %vm69_vm0, %v60_v0  ;;  %v108_v3 = vld [vmem:[#allocation2 + $0x70] sm:$0xff]  ;;  %s286_s18 = smov [#allocation7]   ;;  %s183_s22 = sshll.u32 %s358_s7, 4  ;;  %s184_s22 = int_to_ptr.hbm [resolvable:$true] %s183_s22 }
   0xe   :  { %114 = vmatpush.msra.mxu1 %v109_v2  ;;  %195 = vmatmul.msk.f32.vlgmr.msra.gmra.mxu0 %vm65_vm1, %v59_v1  ;;  %v107_v4 = vld [vmem:[#allocation2 + $0x68] sm:$0xff]  ;;  %v106_v5 = vld [vmem:[#allocation2 + $0x60] sm:$0xff]  ;;  %v105_v6 = vld [vmem:[#allocation2 + $0x58] sm:$0xff]  ;;  %s181_s19 = sshll.u32 %s286_s18, 4  ;;  %s182_s19 = int_to_ptr.vmem [resolvable:$true] %s181_s19 }
   0xf   :  { %v104_v7 = vld [vmem:[#allocation2 + $0x50] sm:$0xff]  ;;  %v103_v8 = vld [vmem:[#allocation2 + $0x48] sm:$0xff]  ;;  %v102_v9 = vld [vmem:[#allocation2 + $0x40] sm:$0xff] }
  0x10   :  { %115 = vmatpush.msra.mxu1 %v108_v3  ;;  %v101_v10 = vld [vmem:[#allocation2 + $0x38] sm:$0xff]  ;;  %v100_v11 = vld [vmem:[#allocation2 + $0x30] sm:$0xff]  ;;  %v99_v12 = vld [vmem:[#allocation2 + $0x28] sm:$0xff] }
  0x11   :  { %v98_v13 = vld [vmem:[#allocation2 + $0x20] sm:$0xff]  ;;  %v97_v14 = vld [vmem:[#allocation2 + $0x18] sm:$0xff]  ;;  %v96_v15 = vld [vmem:[#allocation2 + $0x10] sm:$0xff] }
  0x12   :  { %116 = vmatpush.msra.mxu1 %v107_v4  ;;  %v95_v16 = vld [vmem:[#allocation2 + $0x8] sm:$0xff]  ;;  %v94_v17 = vld [vmem:[#allocation2] sm:$0xff]  ;;  %v150_v18 = vld [vmem:[#allocation5 + $0x78] sm:$0xff] }
  0x13   :  { %v149_v19 = vld [vmem:[#allocation5 + $0x70] sm:$0xff]  ;;  %155 = vmatpush.msra.mxu2 %v150_v18  ;;  %v148_v20 = vld [vmem:[#allocation5 + $0x68] sm:$0xff]  ;;  %v147_v21 = vld [vmem:[#allocation5 + $0x60] sm:$0xff] }
  0x14   :  { %117 = vmatpush.msra.mxu1 %v106_v5  ;;  %v146_v22 = vld [vmem:[#allocation5 + $0x58] sm:$0xff]  ;;  %v145_v23 = vld [vmem:[#allocation5 + $0x50] sm:$0xff]  ;;  %v144_v24 = vld [vmem:[#allocation5 + $0x48] sm:$0xff] }
  0x15   :  { %156 = vmatpush.msra.mxu2 %v149_v19  ;;  %v143_v25 = vld [vmem:[#allocation5 + $0x40] sm:$0xff]  ;;  %v142_v26 = vld [vmem:[#allocation5 + $0x38] sm:$0xff]  ;;  %v141_v27 = vld [vmem:[#allocation5 + $0x30] sm:$0xff] }
  0x16   :  { %118 = vmatpush.msra.mxu1 %v105_v6  ;;  %v140_v28 = vld [vmem:[#allocation5 + $0x28] sm:$0xff]  ;;  %v139_v29 = vld [vmem:[#allocation5 + $0x20] sm:$0xff]  ;;  %v138_v30 = vld [vmem:[#allocation5 + $0x18] sm:$0xff] }
  0x17   :  { %157 = vmatpush.msra.mxu2 %v148_v20  ;;  %v201_v31 = vld [vmem:[%s353_s2] ss:$0 sm:$0xff]  ;;  %v137_v35 = vld [vmem:[#allocation5 + $0x10] sm:$0xff]  ;;  %v136_v36 = vld [vmem:[#allocation5 + $0x8] sm:$0xff] }
  0x18   :  { %119 = vmatpush.msra.mxu1 %v104_v7  ;;  %v135_v37 = vld [vmem:[#allocation5] sm:$0xff] }
  0x19   :  { %158 = vmatpush.msra.mxu2 %v147_v21  ;;  %v202_v38 = vld [vmem:[%s355_s4] ss:$0 sm:$0xff] }
  0x1a   :  { %120 = vmatpush.msra.mxu1 %v103_v8  ;;  %v203_v42 = vld [vmem:[%s357_s6] ss:$0 sm:$0xff] }
  0x1b   :  { %159 = vmatpush.msra.mxu2 %v146_v22 }
  0x1c   :  { %121 = vmatpush.msra.mxu1 %v102_v9 }
  0x1d   :  { %160 = vmatpush.msra.mxu2 %v145_v23 }
  0x1e   :  { %122 = vmatpush.msra.mxu1 %v101_v10 }
  0x1f   :  { %161 = vmatpush.msra.mxu2 %v144_v24 }
  0x20   :  { %123 = vmatpush.msra.mxu1 %v100_v11 }
  0x21   :  { %162 = vmatpush.msra.mxu2 %v143_v25 }
  0x22   :  { %124 = vmatpush.msra.mxu1 %v99_v12 }
  0x23   :  { %163 = vmatpush.msra.mxu2 %v142_v26 }
  0x24   :  { %125 = vmatpush.msra.mxu1 %v98_v13 }
  0x25   :  { %164 = vmatpush.msra.mxu2 %v141_v27 }
  0x26   :  { %126 = vmatpush.msra.mxu1 %v97_v14 }
  0x27   :  { %165 = vmatpush.msra.mxu2 %v140_v28 }
  0x28   :  { %127 = vmatpush.msra.mxu1 %v96_v15 }
  0x29   :  { %166 = vmatpush.msra.mxu2 %v139_v29 }
  0x2a   :  { %128 = vmatpush.msra.mxu1 %v95_v16 }
  0x2b   :  { %167 = vmatpush.msra.mxu2 %v138_v30 }
  0x2c   :  { %129 = vmatpush.msra.mxu1 %v94_v17 }
  0x2d   :  { %168 = vmatpush.msra.mxu2 %v137_v35 }
  0x2f   :  { %169 = vmatpush.msra.mxu2 %v136_v36 }
  0x31   :  { %170 = vmatpush.msra.mxu2 %v135_v37 }
  0x8b   :  { %v90_v32 = vpop.f32.mrf.mxu0 }
  0x8c   :  { %v91_v33 = vadd.f32 %v201_v31, %v90_v32 }
  0x8e   :  { %v93_v34 = vmax.f32 %v91_v33, 0.0 }
  0x90   :  { %130 = vmatmul.f32.vlgmr.msra.gmra.mxu1 %v93_v34 }
 0x10d   :  { %v131_v39 = vpop.f32.mrf.mxu1 }
 0x10e   :  { %v132_v40 = vadd.f32 %v202_v38, %v131_v39 }
 0x110   :  { %v134_v41 = vmax.f32 %v132_v40, 0.0 }
 0x112   :  { %171 = vmatmul.f32.vlgmr.msra.gmra.mxu2 %v134_v41 }
 0x195   :  { %v172_v43 = vpop.f32.mrf.mxu2 }
 0x196   :  { %v173_v44 = vadd.f32 %v203_v42, %v172_v43 }
 0x198   :  { %175 = vst [vmem:[#allocation7] sm:$0xff] %v173_v44 }
 0x199   :  { %186 = dma.vmem_to_hbm [thread:$0]  %s182_s19, 128, %s184_s22, [#allocation4]  }
 0x19a   :  { %280 = dma.done.wait [#allocation4], 128  }
 0x19b   :  { %281 = vsyncadd [#allocation4], 4294967168 }
 0x19c   :  { %191 = vsyncpa [#allocation3], 1 }
 0x19d   :  { %192 = vsyncpa [#allocation6], 1 }
 0x19e   :  { %193 = vsyncpa [#allocation4], 1 }

</bundles_post_ra>
